<compile_context>
chip_gen: v5e
topology: v5e:2x2
jax: 0.10.0
libtpu: 0.0.40
codegen_flags: <defaults>
</compile_context>

<pallas_src>
import jax
import jax.numpy as jnp
from jax.experimental import pallas as pl
from jax.experimental.pallas import tpu as pltpu

_MIB = 1024 * 1024


def sgc_kernel(x_ref, wt_ref, b_ref, o_ref):
    # x_ref : (tm, nfeat)     node-feature row tile (native dtype, streamed)
    # wt_ref: (nfeat, nclass) transposed weight (resident, single buffer)
    # b_ref : (1, nclass)     bias row (resident, single buffer)
    # o_ref : (tm, nclass)    output logits tile
    acc = jnp.dot(x_ref[...], wt_ref[...], preferred_element_type=jnp.float32)
    o_ref[...] = (acc + b_ref[...]).astype(o_ref.dtype)


def _vmem_budgets():
    """Generation-aware VMEM limits: v7x has 64 MiB/TC, v5e/v6e have 128 MiB."""
    try:
        cap = pltpu.get_tpu_info().vmem_capacity_bytes
    except Exception:
        cap = 64 * _MIB                                   # conservative (v7x-sized) default
    vmem_limit = max(min(cap - 16 * _MIB, 100 * _MIB), 32 * _MIB)
    tile_budget = vmem_limit - 8 * _MIB                   # headroom for compiler scratch
    return vmem_limit, tile_budget


def _choose_tm(N, nfeat, nclass, x_itemsize, out_itemsize, tile_budget,
               target_step_bytes=4 * _MIB, min_grid_steps=4):
    """Largest row tile (multiple of 8) that fits VMEM, moves multi-MB per grid step,
    and (for large N) leaves >= min_grid_steps blocks for v7x's two TensorCores."""
    if N <= 8:
        return N

    # Per-row streamed bytes: x tile in + y tile out.  W^T / bias are resident.
    row_bytes = nfeat * x_itemsize + nclass * out_itemsize
    resident = nfeat * nclass * x_itemsize + nclass * 4
    # TODO(synk): for nfeat*nclass too large to keep W^T resident, add a K-tiled accumulator path.
    assert resident < tile_budget, "resident W^T does not fit the VMEM tile budget"

    avail = tile_budget - resident
    tm_vmem = max(avail // (2 * row_bytes), 8)            # double-buffered x & y tiles
    tm_target = max(target_step_bytes // row_bytes, 512)  # amortize ~0.35 us/step overhead
    tm = int(min(tm_vmem, tm_target))

    # Ensure several grid steps for megacore sharding / pipelining, but never shrink
    # tiles below a useful size (keeps tiny-N cases as a single block).
    per_step = -(-N // min_grid_steps)
    if per_step >= 512:
        tm = min(tm, per_step)

    tm = min(tm, N)
    if tm >= N:
        return N                                          # single full-extent block is legal
    return max(8, (tm // 8) * 8)                          # (8, 128) sublane constraint


def prepare_sgc_params(W, b, param_dtype=jnp.float32):
    """One-time parameter prep (hoisted out of the per-call path): W^T and a 2-D bias row."""
    nclass, nfeat = W.shape
    wt = jnp.asarray(W, param_dtype).T                    # (nfeat, nclass)
    b2 = jnp.asarray(b, jnp.float32).reshape(1, nclass)   # (1, nclass)
    return wt, b2


def sgc_forward(x, wt, b2, *, tm=None):
    """y = x @ W.T + b, matching torch.nn.Linear semantics (output in x.dtype)."""
    N, nfeat = x.shape
    nfeat_w, nclass = wt.shape
    assert nfeat == nfeat_w and b2.shape == (1, nclass)
    out_dtype = x.dtype
    x_itemsize = jnp.dtype(x.dtype).itemsize
    out_itemsize = jnp.dtype(out_dtype).itemsize
    wt_itemsize = jnp.dtype(wt.dtype).itemsize

    vmem_limit, tile_budget = _vmem_budgets()
    if tm is None:
        tm = _choose_tm(N, nfeat, nclass, x_itemsize, out_itemsize, tile_budget)
    else:
        tm = min(tm, N)
        if tm < N:
            tm = max(8, (tm // 8) * 8)

    grid = (pl.cdiv(N, tm),)

    cost = pl.CostEstimate(
        flops=2 * N * nfeat * nclass,
        transcendentals=0,
        bytes_accessed=(N * nfeat * x_itemsize            # x reads
                        + nfeat * nclass * wt_itemsize     # W^T (read once, resident)
                        + nclass * 4                       # bias
                        + N * nclass * out_itemsize),      # y writes (unpadded)
    )

    def resident(shape):
        # Constant index_map => one pipeline buffer is enough (halves resident VMEM).
        return pl.BlockSpec(shape, lambda i: (0, 0), pipeline_mode=pl.Buffered(1))

    return pl.pallas_call(
        sgc_kernel,
        out_shape=jax.ShapeDtypeStruct((N, nclass), out_dtype),
        grid_spec=pltpu.PrefetchScalarGridSpec(
            num_scalar_prefetch=0,
            grid=grid,
            in_specs=[
                pl.BlockSpec((tm, nfeat), lambda i: (i, 0)),   # streamed x row tile
                resident((nfeat, nclass)),                     # resident W^T
                resident((1, nclass)),                         # resident bias row
            ],
            out_specs=pl.BlockSpec((tm, nclass), lambda i: (i, 0)),
        ),
        compiler_params=pltpu.CompilerParams(
            dimension_semantics=("parallel",),
            vmem_limit_bytes=vmem_limit),
        cost_estimate=cost,
    )(x, wt, b2)


if __name__ == "__main__":
    # Small, tiling-friendly shapes: 64 nodes, 32 features, 16 classes.
    N, nfeat, nclass = 64, 32, 16

    key = jax.random.PRNGKey(0)
    kx, kw, kb = jax.random.split(key, 3)

    x = jax.random.normal(kx, (N, nfeat), dtype=jnp.float32)
    # Deterministic parameter init mimicking nn.Linear's uniform(-1/sqrt(fan_in), 1/sqrt(fan_in)).
    bound = 1.0 / (nfeat ** 0.5)
    W = jax.random.uniform(kw, (nclass, nfeat), dtype=jnp.float32,
                           minval=-bound, maxval=bound)
    b = jax.random.uniform(kb, (nclass,), dtype=jnp.float32,
                           minval=-bound, maxval=bound)

    wt, b2 = prepare_sgc_params(W, b)          # one-time weight prep
    y = jax.block_until_ready(sgc_forward(x, wt, b2))

    # Correctness check against the plain-JAX f32 reference of nn.Linear.
    y_ref = x @ W.T + b
    assert y.shape == (N, nclass)
    assert y.dtype == x.dtype
    assert jnp.allclose(y, y_ref, atol=1e-2, rtol=1e-2), "mismatch vs reference"

    print("KERNEL_OK")
</pallas_src>

<mosaic_0001>
module attributes {stable_mosaic.version = 11 : i64} {
  func.func @sgc_kernel(%arg0: i32, %arg1: memref<64x32xf32, #tpu.memory_space<vmem>>, %arg2: memref<32x16xf32, #tpu.memory_space<vmem>>, %arg3: memref<1x16xf32, #tpu.memory_space<vmem>>, %arg4: memref<64x16xf32, #tpu.memory_space<vmem>>) attributes {dimension_semantics = [#tpu.dimension_semantics<parallel>], iteration_bounds = array<i64: 1>, scalar_prefetch = 0 : i64, scratch_operands = 0 : i64, tpu.core_type = #tpu.core_type<tc>, window_params = [{transform_indices = @transform_0, window_bounds = array<i64: 64, 32>}, {pipeline_mode = #tpu.pipeline_mode<synchronous>, transform_indices = @transform_1, window_bounds = array<i64: 32, 16>}, {pipeline_mode = #tpu.pipeline_mode<synchronous>, transform_indices = @transform_2, window_bounds = array<i64: 1, 16>}, {transform_indices = @transform_3, window_bounds = array<i64: 64, 16>}]} {
    %c0 = arith.constant 0 : index
    %c0_0 = arith.constant 0 : index
    %0 = vector.load %arg1[%c0, %c0_0] : memref<64x32xf32, #tpu.memory_space<vmem>>, vector<64x32xf32>
    %c0_1 = arith.constant 0 : index
    %c0_2 = arith.constant 0 : index
    %1 = vector.load %arg2[%c0_1, %c0_2] : memref<32x16xf32, #tpu.memory_space<vmem>>, vector<32x16xf32>
    %cst = arith.constant dense<0.000000e+00> : vector<64x16xf32>
    %2 = tpu.matmul %0, %1, %cst {dimension_numbers = #tpu.dot_dimension_numbers<[1], [0], [0], [1], [0, 0, 1, 1], [], []>} : vector<64x32xf32>, vector<32x16xf32>, vector<64x16xf32> -> vector<64x16xf32>
    %c0_3 = arith.constant 0 : index
    %c0_4 = arith.constant 0 : index
    %3 = vector.load %arg3[%c0_3, %c0_4] : memref<1x16xf32, #tpu.memory_space<vmem>>, vector<1x16xf32>
    %4 = vector.broadcast %3 : vector<1x16xf32> to vector<64x16xf32>
    %5 = arith.addf %2, %4 : vector<64x16xf32>
    %c0_5 = arith.constant 0 : index
    %c0_6 = arith.constant 0 : index
    %6 = vector.load %arg4[%c0_5, %c0_6] : memref<64x16xf32, #tpu.memory_space<vmem>>, vector<64x16xf32>
    tpu.vector_store %arg4[%c0_5, %c0_6], %5 {strides = array<i32>} : memref<64x16xf32, #tpu.memory_space<vmem>>, vector<64x16xf32>,
    return
  }
  func.func @transform_0(%arg0: i32) -> (i32, i32) {
    %c0_i32 = arith.constant 0 : i32
    %c0_i32_0 = arith.constant 0 : i32
    return %arg0, %c0_i32 : i32, i32
  }
  func.func @transform_1(%arg0: i32) -> (i32, i32) {
    %c0_i32 = arith.constant 0 : i32
    %c0_i32_0 = arith.constant 0 : i32
    %c0_i32_1 = arith.constant 0 : i32
    return %c0_i32, %c0_i32_0 : i32, i32
  }
  func.func @transform_2(%arg0: i32) -> (i32, i32) {
    %c0_i32 = arith.constant 0 : i32
    %c0_i32_0 = arith.constant 0 : i32
    %c0_i32_1 = arith.constant 0 : i32
    return %c0_i32, %c0_i32_0 : i32, i32
  }
  func.func @transform_3(%arg0: i32) -> (i32, i32) {
    %c0_i32 = arith.constant 0 : i32
    %c0_i32_0 = arith.constant 0 : i32
    return %arg0, %c0_i32 : i32, i32
  }
}

</mosaic_0001>

<bundles_post_ra>
// kernel: tpu_custom_call.1
= control target key start
LH: loop header
LB: loop body
LE: loop exit
PB: predicated region body
PF: predicated region fallthrough
CT: control target
= control target key end

     0   :  { %vm30_vm0 = vcmask 261120   ;;  %vm96_vm1 = vcmask 130048   ;;  %s229_s1 = inlined_call_operand.vmem [shape: f32[32,16], index: 1, kind: input, shape index: {}]   ;;  %s230_s0 = inlined_call_operand.vmem [shape: f32[64,32], index: 0, kind: input, shape index: {}]   ;;  %s231_s2 = inlined_call_operand.vmem [shape: f32[1,16], index: 2, kind: input, shape index: {}]   ;;  %s232_s3 = inlined_call_operand.vmem [shape: f32[64,16], index: 3, kind: output, shape index: {}]  }
   0x1   :  { %v25_v0 = vld [vmem:[%s229_s1 + $0x18] sm:$0xff]  ;;  %v24_v1 = vld [vmem:[%s229_s1 + $0x10] sm:$0xff]  ;;  %v23_v2 = vld [vmem:[%s229_s1 + $0x8] sm:$0xff] }
   0x2   :  { %118 = vmatpush.msra.mxu2 %v25_v0  ;;  %119 = vmatpush.msra.mxu3 %v25_v0  ;;  %v22_v3 = vld [vmem:[%s229_s1] sm:$0xff]  ;;  %v20_v5 = vld [vmem:[%s230_s0 + $0x30] sm:$0xff]  ;;  %v19_v8 = vld [vmem:[%s230_s0 + $0x28] sm:$0xff] }
   0x3   :  { %67 = vmatpush.msra.mxu0 %v25_v0  ;;  %117 = vmatpush.msra.mxu1 %v25_v0  ;;  %v18_v4 = vld [vmem:[%s230_s0 + $0x20] sm:$0xff]  ;;  %v16_v7 = vld [vmem:[%s230_s0 + $0x10] sm:$0xff]  ;;  %v21_v9 = vld [vmem:[%s230_s0 + $0x38] sm:$0xff] }
   0x4   :  { %121 = vmatpush.msra.mxu2 %v24_v1  ;;  %122 = vmatpush.msra.mxu3 %v24_v1  ;;  %v14_v6 = vld [vmem:[%s230_s0] sm:$0xff]  ;;  %v15_v10 = vld [vmem:[%s230_s0 + $0x8] sm:$0xff]  ;;  %v17_v11 = vld [vmem:[%s230_s0 + $0x18] sm:$0xff] }
   0x5   :  { %68 = vmatpush.msra.mxu0 %v24_v1  ;;  %120 = vmatpush.msra.mxu1 %v24_v1  ;;  %v129_v12 = vld [vmem:[%s231_s2] ss:$0 sm:$0xff] }
   0x6   :  { %124 = vmatpush.msra.mxu2 %v23_v2  ;;  %125 = vmatpush.msra.mxu3 %v23_v2 }
   0x7   :  { %69 = vmatpush.msra.mxu0 %v23_v2  ;;  %123 = vmatpush.msra.mxu1 %v23_v2 }
   0x8   :  { %127 = vmatpush.msra.mxu2 %v22_v3  ;;  %128 = vmatpush.msra.mxu3 %v22_v3 }
   0x9   :  { %113 = vmatmul.msk.f32.vlgmr.msra.gmra.mxu2 %vm30_vm0, %v18_v4  ;;  %115 = vmatmul.msk.f32.vlgmr.msra.gmra.mxu3 %vm30_vm0, %v20_v5 }
   0xa   :  { %70 = vmatpush.msra.mxu0 %v22_v3  ;;  %126 = vmatpush.msra.mxu1 %v22_v3 }
   0xb   :  { %109 = vmatmul.msk.f32.vlgmr.msra.gmra.mxu0 %vm30_vm0, %v14_v6  ;;  %111 = vmatmul.msk.f32.vlgmr.msra.gmra.mxu1 %vm30_vm0, %v16_v7 }
  0x11   :  { %114 = vmatmul.msk.f32.gmra.mxu2 %vm30_vm0, %v19_v8  ;;  %116 = vmatmul.msk.f32.gmra.mxu3 %vm30_vm0, %v21_v9 }
  0x13   :  { %110 = vmatmul.msk.f32.gmra.mxu0 %vm30_vm0, %v15_v10  ;;  %112 = vmatmul.msk.f32.gmra.mxu1 %vm30_vm0, %v17_v11 }
  0x88   :  { %v72_v13 = vpop.f32.mrf.mxu0  ;;  %v78_v14 = vpop.f32.mrf.mxu1 }
  0x89   :  { %v73_v15 = vadd.f32 %v129_v12, %v72_v13  ;;  %v79_v16 = vadd.f32 %v129_v12, %v78_v14 }
  0x8b   :  { %97 = vst.msk [vmem:[%s232_s3] sm:$0xff] %vm96_vm1, %v73_v15 }
  0x8c   :  { %99 = vst.msk [vmem:[%s232_s3 + $0x10] sm:$0xff] %vm96_vm1, %v79_v16  ;;  %v84_v17 = vpop.f32.mrf.mxu2  ;;  %v90_v18 = vpop.f32.mrf.mxu3 }
  0x8d   :  { %v85_v19 = vadd.f32 %v129_v12, %v84_v17  ;;  %v91_v20 = vadd.f32 %v129_v12, %v90_v18 }
  0x8f   :  { %101 = vst.msk [vmem:[%s232_s3 + $0x20] sm:$0xff] %vm96_vm1, %v85_v19 }
  0x90   :  { %103 = vst.msk [vmem:[%s232_s3 + $0x30] sm:$0xff] %vm96_vm1, %v91_v20  ;;  %v75_v21 = vpop.f32.mrf.mxu0  ;;  %v81_v22 = vpop.f32.mrf.mxu1 }
  0x91   :  { %v76_v23 = vadd.f32 %v129_v12, %v75_v21  ;;  %v82_v24 = vadd.f32 %v129_v12, %v81_v22 }
  0x93   :  { %98 = vst.msk [vmem:[%s232_s3 + $0x8] sm:$0xff] %vm96_vm1, %v76_v23 }
  0x94   :  { %100 = vst.msk [vmem:[%s232_s3 + $0x18] sm:$0xff] %vm96_vm1, %v82_v24  ;;  %v87_v25 = vpop.f32.mrf.mxu2  ;;  %v93_v26 = vpop.f32.mrf.mxu3 }
  0x95   :  { %v88_v27 = vadd.f32 %v129_v12, %v87_v25  ;;  %v94_v28 = vadd.f32 %v129_v12, %v93_v26 }
  0x97   :  { %102 = vst.msk [vmem:[%s232_s3 + $0x28] sm:$0xff] %vm96_vm1, %v88_v27 }
  0x98   :  { %104 = vst.msk [vmem:[%s232_s3 + $0x38] sm:$0xff] %vm96_vm1, %v94_v28 }

</bundles_post_ra>
